<compile_context>
chip_gen: v5e
topology: v5e:2x2
jax: 0.10.0
libtpu: 0.0.40
codegen_flags: <defaults>
</compile_context>

<pallas_src>
import functools

import jax
import jax.numpy as jnp
from jax.experimental import pallas as pl
from jax.experimental.pallas import tpu as pltpu


VMEM_LIMIT = 48 * 1024 * 1024  # fits v7x's 64 MiB/TC with headroom; fine on v5e/v6e


def _round_up(x, m):
    return ((x + m - 1) // m) * m


def _pick_tiles(n):
    """Row tile (tile_m), reduction tile (tile_k), padded node count."""
    n128 = _round_up(n, 128)
    if n128 >= 2048:
        tile_k = 2048            # 2 MiB bf16 A blocks, double-buffered -> 4 MiB
    elif n128 >= 1024:
        tile_k = 1024
    elif n128 >= 512:
        tile_k = 512
    else:
        tile_k = n128            # single k tile for small graphs
    n_pad = _round_up(n, tile_k)
    if n_pad >= 1024:
        tile_m = 512
    elif n_pad >= 512:
        tile_m = 256
    else:
        tile_m = max(n_pad // 2, 8)   # always >=2 row blocks (v7x megacore)
    return tile_m, tile_k, n_pad


# ----------------------------- kernels ------------------------------------- #

def _proj_kernel(x_ref, w_ref, o_ref):
    # h1[i-tile] = X[i-tile] @ W1   (bf16 in, f32 accumulate, bf16 out)
    o_ref[...] = jnp.dot(x_ref[...], w_ref[...],
                         preferred_element_type=jnp.float32).astype(o_ref.dtype)


def _agg_fused_kernel(kstart_ref, klen_ref, a_ref, h_ref, b_ref, wn_ref,
                      o_ref, acc_ref, *, tile_k):
    # out[i-tile] = relu( sum_k A[i, k] @ H[k] + b ) @ W_next
    i = pl.program_id(0)
    kk = pl.program_id(1)

    @pl.when(kk == 0)
    def _():
        acc_ref[...] = jnp.zeros_like(acc_ref)

    # Skip all-zero A tiles outside this row-tile's nonzero column-tile band.
    @pl.when(kk < klen_ref[i])
    def _():
        k_abs = kstart_ref[i] + kk
        off = pl.multiple_of(k_abs * tile_k, tile_k)
        acc_ref[...] += jnp.dot(a_ref[...], h_ref[pl.ds(off, tile_k), :],
                                preferred_element_type=jnp.float32)

    @pl.when(kk == pl.num_programs(1) - 1)
    def _():
        z = jnp.maximum(acc_ref[...] + b_ref[...], 0.0)
        o_ref[...] = jnp.dot(z.astype(wn_ref.dtype), wn_ref[...],
                             preferred_element_type=jnp.float32).astype(o_ref.dtype)


def _pool_head_kernel(p_ref, y_ref, bl_ref, o_ref, acc_ref):
    # out = sum_k P[:, k-tile] @ Y[k-tile] + bl     (bf16 x bf16, f32 acc)
    k = pl.program_id(0)

    @pl.when(k == 0)
    def _():
        acc_ref[...] = jnp.zeros_like(acc_ref)

    acc_ref[...] += jnp.dot(p_ref[...], y_ref[...],
                            preferred_element_type=jnp.float32)

    @pl.when(k == pl.num_programs(0) - 1)
    def _():
        o_ref[...] = acc_ref[...] + bl_ref[...]


# ----------------------------- wrapper ------------------------------------- #

def gcn_forward(x, edge_index, batch, params, num_graphs):
    """x: (N, 139) f32; edge_index: (2, E) int32 (src, dst); batch: (N,) int32."""
    n, in_dim = x.shape
    out_dim = params["wl"].shape[1]

    f_pad = _round_up(in_dim, 128)       # 139 -> 256
    h_pad = _round_up(params["w1"].shape[1], 128)   # 32 -> 128
    o_pad = _round_up(out_dim, 128)      # 100 -> 128
    g_pad = _round_up(num_graphs, 8)

    tile_m, tile_k, n_pad = _pick_tiles(n)
    num_it = n_pad // tile_m
    num_kt = n_pad // tile_k

    src, dst = edge_index[0].astype(jnp.int32), edge_index[1].astype(jnp.int32)
    idx = jnp.arange(n, dtype=jnp.int32)

    # --- glue: A_hat = D^-1/2 (A + I) D^-1/2, built directly in bf16 -------- #
    deg = jnp.ones((n,), jnp.float32).at[dst].add(1.0)       # in-degree + self loop
    dinv = 1.0 / jnp.sqrt(deg)
    a_hat = (jnp.zeros((n_pad, n_pad), jnp.bfloat16)
             .at[dst, src].add((dinv[dst] * dinv[src]).astype(jnp.bfloat16))
             .at[idx, idx].add((dinv * dinv).astype(jnp.bfloat16)))

    # --- glue: per-row-tile nonzero column-tile band (for SMEM prefetch) ---- #
    rows = jnp.concatenate([dst, idx])
    cols = jnp.concatenate([src, idx])
    r_t = rows // tile_m
    c_t = cols // tile_k
    kmin = jnp.full((num_it,), num_kt - 1, jnp.int32).at[r_t].min(c_t)
    kmax = jnp.zeros((num_it,), jnp.int32).at[r_t].max(c_t)
    k_start = jnp.minimum(kmin, kmax)                 # empty (padding) row tiles -> 0
    k_len = jnp.maximum(kmax - kmin + 1, 1)           # always >= 1, stays in range

    # --- glue: mean-pooling matrix (G_pad, N_pad) bf16, zero in padding ------ #
    onehot = (batch[None, :] == jnp.arange(num_graphs)[:, None]).astype(jnp.float32)
    p_mat = onehot / jnp.maximum(onehot.sum(axis=1, keepdims=True), 1.0)
    p_mat = (jnp.zeros((g_pad, n_pad), jnp.bfloat16)
             .at[:num_graphs, :n].set(p_mat.astype(jnp.bfloat16)))

    # --- pad inputs / parameters to lane-dense shapes ------------------------ #
    def pad2(m, r, c, dtype):
        out = jnp.zeros((r, c), dtype)
        return out.at[:m.shape[0], :m.shape[1]].set(m.astype(dtype))

    x_p = pad2(x, n_pad, f_pad, jnp.bfloat16)
    w1_p = pad2(params["w1"], f_pad, h_pad, jnp.bfloat16)
    w2_p = pad2(params["w2"], h_pad, h_pad, jnp.bfloat16)
    w3_p = pad2(params["w3"], h_pad, h_pad, jnp.bfloat16)
    wl_p = pad2(params["wl"], h_pad, o_pad, jnp.bfloat16)
    b1_p = pad2(params["b1"], 1, h_pad, jnp.float32)
    b2_p = pad2(params["b2"], 1, h_pad, jnp.float32)
    b3_p = pad2(params["b3"], 1, h_pad, jnp.float32)
    bl_p = pad2(params["bl"], 1, o_pad, jnp.float32)

    # --- k0: input projection h1 = X @ W1 ------------------------------------ #
    h = pl.pallas_call(
        _proj_kernel,
        out_shape=jax.ShapeDtypeStruct((n_pad, h_pad), jnp.bfloat16),
        grid_spec=pltpu.PrefetchScalarGridSpec(
            num_scalar_prefetch=0,
            grid=(num_it,),
            in_specs=[pl.BlockSpec((tile_m, f_pad), lambda i: (i, 0)),
                      pl.BlockSpec((f_pad, h_pad), lambda i: (0, 0))],
            out_specs=pl.BlockSpec((tile_m, h_pad), lambda i: (i, 0)),
        ),
        compiler_params=pltpu.CompilerParams(
            dimension_semantics=("parallel",),
            vmem_limit_bytes=VMEM_LIMIT),
        cost_estimate=pl.CostEstimate(
            flops=2 * n_pad * f_pad * h_pad,
            transcendentals=0,
            bytes_accessed=2 * (n_pad * f_pad + f_pad * h_pad + n_pad * h_pad)),
    )(x_p, w1_p)

    # --- k1..k3: tiled A @ H, fused bias + ReLU + next-weight --------------- #
    def agg_layer(h_in, bias, w_next):
        hn = w_next.shape[1]
        kernel = functools.partial(_agg_fused_kernel, tile_k=tile_k)
        return pl.pallas_call(
            kernel,
            out_shape=jax.ShapeDtypeStruct((n_pad, hn), jnp.bfloat16),
            grid_spec=pltpu.PrefetchScalarGridSpec(
                num_scalar_prefetch=2,            # k_start, k_len -> SMEM
                grid=(num_it, num_kt),
                in_specs=[
                    # A tile: column-tile index clamped to the nonzero band
                    # (repeated index -> no re-DMA on skipped steps).
                    pl.BlockSpec(
                        (tile_m, tile_k),
                        lambda i, k, ks, kl: (i, ks[i] + jnp.minimum(k, kl[i] - 1))),
                    # H kept fully resident in VMEM; sliced in-kernel with pl.ds.
                    pl.BlockSpec((n_pad, h_pad), lambda i, k, ks, kl: (0, 0)),
                    pl.BlockSpec((1, h_pad), lambda i, k, ks, kl: (0, 0)),
                    pl.BlockSpec((h_pad, hn), lambda i, k, ks, kl: (0, 0)),
                ],
                out_specs=pl.BlockSpec((tile_m, hn), lambda i, k, ks, kl: (i, 0)),
                scratch_shapes=[pltpu.VMEM((tile_m, h_pad), jnp.float32)],
            ),
            compiler_params=pltpu.CompilerParams(
                dimension_semantics=("parallel", "arbitrary"),
                vmem_limit_bytes=VMEM_LIMIT),
            cost_estimate=pl.CostEstimate(
                flops=2 * n_pad * n_pad * h_pad + 2 * n_pad * h_pad * hn,
                transcendentals=0,
                bytes_accessed=(2 * n_pad * n_pad        # A (bf16, upper bound)
                                + 2 * n_pad * h_pad      # H (resident, read once)
                                + 2 * n_pad * hn)),      # out (bf16)
        )(k_start, k_len, a_hat, h_in, bias, w_next)

    h = agg_layer(h, b1_p, w2_p)          # conv1 -> relu, fused @W2
    h = agg_layer(h, b2_p, w3_p)          # conv2 -> relu, fused @W3
    y = agg_layer(h, b3_p, wl_p)          # conv3 -> relu, fused @Wl (spec has relu)

    # F.dropout(p=0.5) in eval mode is the identity.
    # TODO(synk): training-mode dropout (pltpu.prng_random_bits mask) not emitted.

    # --- k4: mean pooling + head bias (kept separate so i stays "parallel") -- #
    out = pl.pallas_call(
        _pool_head_kernel,
        out_shape=jax.ShapeDtypeStruct((g_pad, o_pad), jnp.float32),
        grid_spec=pltpu.PrefetchScalarGridSpec(
            num_scalar_prefetch=0,
            grid=(num_kt,),
            in_specs=[pl.BlockSpec((g_pad, tile_k), lambda k: (0, k)),
                      pl.BlockSpec((tile_k, o_pad), lambda k: (k, 0)),
                      pl.BlockSpec((1, o_pad), lambda k: (0, 0))],
            out_specs=pl.BlockSpec((g_pad, o_pad), lambda k: (0, 0)),
            scratch_shapes=[pltpu.VMEM((g_pad, o_pad), jnp.float32)],
        ),
        compiler_params=pltpu.CompilerParams(
            dimension_semantics=("arbitrary",),
            vmem_limit_bytes=VMEM_LIMIT),
    )(p_mat, y, bl_p)

    # strip graph / output-channel padding
    return out[:num_graphs, :out_dim]


# ----------------------------- params -------------------------------------- #

def init_params(key, in_channels=139, hidden_channels=32, out_channels=100):
    ks = jax.random.split(key, 8)

    def glorot(k, fan_in, fan_out):
        lim = jnp.sqrt(6.0 / (fan_in + fan_out))
        return jax.random.uniform(k, (fan_in, fan_out), jnp.float32, -lim, lim)

    return {
        "w1": glorot(ks[0], in_channels, hidden_channels),
        "b1": jnp.zeros((1, hidden_channels), jnp.float32),
        "w2": glorot(ks[1], hidden_channels, hidden_channels),
        "b2": jnp.zeros((1, hidden_channels), jnp.float32),
        "w3": glorot(ks[2], hidden_channels, hidden_channels),
        "b3": jnp.zeros((1, hidden_channels), jnp.float32),
        "wl": glorot(ks[3], hidden_channels, out_channels),
        "bl": jax.random.uniform(ks[4], (1, out_channels), jnp.float32, -0.1, 0.1),
    }


if __name__ == "__main__":
    key = jax.random.PRNGKey(0)
    k_x, k_p = jax.random.split(key)

    # Small deterministic example: 2 graphs of 4 nodes each (N=8), 139 features.
    num_nodes = 8
    num_graphs = 2
    hidden_channels = 32

    x = jax.random.normal(k_x, (num_nodes, 139), jnp.float32)

    # Undirected 4-node ring within each graph (edges listed in both directions).
    edges = []
    for g in range(num_graphs):
        base = 4 * g
        for i in range(4):
            a, b = base + i, base + (i + 1) % 4
            edges.append((a, b))
            edges.append((b, a))
    edge_index = jnp.array(edges, dtype=jnp.int32).T          # (2, E)
    batch = jnp.array([0, 0, 0, 0, 1, 1, 1, 1], dtype=jnp.int32)

    params = init_params(k_p, 139, hidden_channels, 100)

    out = gcn_forward(x, edge_index, batch, params, num_graphs)
    out = jax.block_until_ready(out)
    assert out.shape == (num_graphs, 100) and out.dtype == jnp.float32
    print("KERNEL_OK")
</pallas_src>

<mosaic_0001>
module attributes {stable_mosaic.version = 11 : i64} {
  func.func @_proj_kernel(%arg0: i32, %arg1: memref<64x256xbf16, #tpu.memory_space<vmem>>, %arg2: memref<256x128xbf16, #tpu.memory_space<vmem>>, %arg3: memref<64x128xbf16, #tpu.memory_space<vmem>>) attributes {dimension_semantics = [#tpu.dimension_semantics<parallel>], iteration_bounds = array<i64: 2>, scalar_prefetch = 0 : i64, scratch_operands = 0 : i64, tpu.core_type = #tpu.core_type<tc>, window_params = [{transform_indices = @transform_0, window_bounds = array<i64: 64, 256>}, {pipeline_mode = #tpu.pipeline_mode<synchronous>, transform_indices = @transform_1, window_bounds = array<i64: 256, 128>}, {transform_indices = @transform_2, window_bounds = array<i64: 64, 128>}]} {
    %c0 = arith.constant 0 : index
    %c0_0 = arith.constant 0 : index
    %0 = vector.load %arg1[%c0, %c0_0] : memref<64x256xbf16, #tpu.memory_space<vmem>>, vector<64x256xbf16>
    %c0_1 = arith.constant 0 : index
    %c0_2 = arith.constant 0 : index
    %1 = vector.load %arg2[%c0_1, %c0_2] : memref<256x128xbf16, #tpu.memory_space<vmem>>, vector<256x128xbf16>
    %cst = arith.constant dense<0.000000e+00> : vector<64x128xf32>
    %2 = tpu.matmul %0, %1, %cst {dimension_numbers = #tpu.dot_dimension_numbers<[1], [0], [0], [1], [0, 0, 1, 1], [], []>} : vector<64x256xbf16>, vector<256x128xbf16>, vector<64x128xf32> -> vector<64x128xf32>
    %3 = arith.truncf %2 : vector<64x128xf32> to vector<64x128xbf16>
    %c0_3 = arith.constant 0 : index
    %c0_4 = arith.constant 0 : index
    %4 = vector.load %arg3[%c0_3, %c0_4] : memref<64x128xbf16, #tpu.memory_space<vmem>>, vector<64x128xbf16>
    tpu.vector_store %arg3[%c0_3, %c0_4], %3 {strides = array<i32>} : memref<64x128xbf16, #tpu.memory_space<vmem>>, vector<64x128xbf16>,
    return
  }
  func.func @transform_0(%arg0: i32) -> (i32, i32) {
    %c0_i32 = arith.constant 0 : i32
    %c0_i32_0 = arith.constant 0 : i32
    return %arg0, %c0_i32 : i32, i32
  }
  func.func @transform_1(%arg0: i32) -> (i32, i32) {
    %c0_i32 = arith.constant 0 : i32
    %c0_i32_0 = arith.constant 0 : i32
    %c0_i32_1 = arith.constant 0 : i32
    return %c0_i32, %c0_i32_0 : i32, i32
  }
  func.func @transform_2(%arg0: i32) -> (i32, i32) {
    %c0_i32 = arith.constant 0 : i32
    %c0_i32_0 = arith.constant 0 : i32
    return %arg0, %c0_i32 : i32, i32
  }
}

</mosaic_0001>

<bundles_post_ra>
// kernel: tpu_custom_call.1
= control target key start
LH: loop header
LB: loop body
LE: loop exit
PB: predicated region body
PF: predicated region fallthrough
CT: control target
= control target key end

     0   :  { %7 = vsyncpa [#allocation3], 0  ;;  %s1088_s0 = inlined_call_operand.hbm [shape: bf16[128,256], index: 0, kind: input, shape index: {}]   ;;  %s1089_s1 = inlined_call_operand.hbm [shape: bf16[256,128], index: 1, kind: input, shape index: {}]   ;;  %s1090_s2 = inlined_call_operand.hbm [shape: bf16[128,128], index: 2, kind: output, shape index: {}]  }
   0x1   :  { %9 = vsyncpa [#allocation3 + $0x1], 0 }
   0x2   :  { %10 = vsyncpa [#allocation6], 0 }
   0x3   :  { %11 = vsyncpa [#allocation4], 0 }
   0x4   :  { %13 = vsyncpa [#allocation4 + $0x1], 0  ;;  %s929_s9 = smov 0   ;;  %s931_s10 = smov 0  }
   0x5   :  { %s933_s11 = smov 0   ;;  %s935_s12 = smov 0  }
   0x6 LB: > { %s950_s13 = sadd.s32 4294967295, %s905_s12   ;;  %s533_s14 = sadd.s32 4294967294, %s905_s12   ;;  %s905_s12 = sphi %s935_s12, %s1100_s12   ;;  %s901_s11 = sphi %s933_s11, %s1099_s11   ;;  %s897_s10 = sphi %s931_s10, %s1098_s10   ;;  %s893_s9 = sphi %s929_s9, %s1097_s9  }
   0x7   : > { %p39_p0 = scmp.ne.s32.totalorder %s897_s10, %s893_s9  ;;  %p40_p1 = scmp.eq.s32.totalorder %s950_s13, 0 }
   0x8   : > { %p84_p2 = scmp.eq.s32.totalorder %s950_s13, 1  ;;  %p90_p3 = scmp.eq.s32.totalorder %s533_s14, 1 }
   0x9   : > { %p959_p4 = por %p40_p1, %p39_p0  ;;  %p534_p5 = scmp.ge.s32.totalorder %s905_s12, 1 }
   0xa   : > { %p964_p6 = por %p90_p3, %p39_p0  ;;  %p97_p7 = scmp.lt.s32.totalorder %s905_s12, 3 }
   0xb   : > { %s108_s19 = sshll.u32 %s1089_s1, 4  ;;  %s907_s21 = smov [#allocation5]   ;;  %s109_s19 = int_to_ptr.hbm [resolvable:$true] %s108_s19 }
   0xc   : > { %p972_p8 = pnand %p534_p5, %p97_p7  ;;  %s110_s22 = sshll.u32 %s907_s21, 4  ;;  %s111_s22 = int_to_ptr.vmem [resolvable:$true] %s110_s22 }
   0xd   : > { %s982_s23 = sadd.s32 1, %s905_s12   ;;  %s908_s24 = smov 64  }
   0xe   : > { %p720_p9 = pneg %p972_p8  ;;  %s909_s25 = smov 4  }
   0xf   : > { %s23_s26 = ssub.s32 %s905_s12, %s982_s23  ;;  %s26_s27 = sadd.s32 1, %s901_s11 }
  0x10   : > { %p721_p10 = pnand %p720_p9, %p40_p1  ;;  %p24_p12 = scmp.eq.s32.totalorder %s23_s26, 0 }
  0x11   : > { %p33_p13 = scmp.ne.s32.totalorder %s901_s11, %s897_s10  ;;  %p34_p0 = scmp.eq.s32.totalorder %s905_s12, 0 }
  0x12   : > { %723 = dma.hbm_to_vmem [thread:$0]  (!%p721_p10), %s109_s19, 2048, %s111_s22, [#allocation6], %s908_s24, %s908_s24, %s909_s25  }
  0x13   : > { %p733_p3 = scmp.lt.s32.totalorder %s905_s12, 2  ;;  %p35_p5 = por %p34_p0, %p33_p13 }
  0x14   : > { %s992_s28 = scalar_select %p24_p12, %s901_s11, %s26_s27  }
  0x15   : > { %p996_p7 = por %p84_p2, %p33_p13  ;;  %s124_s30 = sand.u32 1, %s901_s11  }
  0x16   : > { %s647_s3 = sshll.u32 %s905_s12, 6  ;;  %s537_s4 = sshll.u32 %s124_s30, 6 }
  0x17   : > { %s134_s7 = scalar_lea.hbm %s1088_s0, %s647_s3  ;;  %s128_s14 = scalar_lea.vmem [#allocation2], %s537_s4 }
  0x18   : > { %s135_s8 = sshll.u32 %s134_s7, 4  ;;  %s137_s17 = sshll.u32 %s128_s14, 4  ;;  %s136_s8 = int_to_ptr.hbm [resolvable:$true] %s135_s8  ;;  %s138_s17 = int_to_ptr.vmem [resolvable:$true] %s137_s17 }
  0x19   : > { %p1007_p9 = pnand %p733_p3, %p35_p5  ;;  %s125_s19 = scalar_lea.sflag [#allocation3], %s124_s30 }
  0x1a   : > { %s805_s21 = sshra.s32 %s136_s8, 4  ;;  %s812_s26 = scalar_lea.hbm %s1088_s0, 128  ;;  %s806_s21 = int_to_ptr.hbm [resolvable:$true] %s805_s21 }
  0x1b   : > { %s807_s22 = scalar_lea.hbm %s806_s21, 64  ;;  %p809_p10 = pneg %p1007_p9 }
  0x1c   : > { %p808_p2 = scmp.ne.s32.totalorder %s806_s21, %s807_s22  ;;  %p813_p0 = scmp.lt.s32.totalorder %s806_s21, %s1088_s0 }
  0x1d   : > { %p814_p3 = scmp.lt.s32.totalorder %s812_s26, %s807_s22 }
  0x1e   : > { %p810_p12 = pnand %p809_p10, %p808_p2 }
  0x1f   : > { %p815_p5 = por %p814_p3, %p813_p0 }
  0x20   : > { %p811_p13 = pneg %p810_p12 }
  0x22   : > { %p816_p11 = pnand %p815_p5, %p811_p13 }
  0x24   : > { %819 = shalt.err (!%p816_p11)
}
  0x25   : > { %s910_s30 = smov 128   ;;  %s911_s4 = smov 8  }
  0x26   : > { %727 = dma.hbm_to_vmem [thread:$0]  (!%p1007_p9), %s136_s8, 1024, %s138_s17, %s125_s19, %s910_s30, %s910_s30, %s911_s4  }
  0x27   : > { %149 = sbr.rel (%p972_p8) target bundleno = 244 (0xf4), region = 28  ;;  %s1024_s5 = sand.u32 (!%p972_p8), 1, %s897_s10  }
  0x28   : > { %s542_s6 = sshll.u32 (!%p972_p8), %s1024_s5, 6  ;;  %s152_s7 = scalar_lea.sflag (!%p972_p8), [#allocation3], %s1024_s5 }
  0x29   : > { %s1028_s14 = scalar_lea.vmem (!%p972_p8), [#allocation2], %s542_s6 }
  0x2c   : > { %880 = dma.done.wait (%p959_p4), %s152_s7, 1024  }
  0x2d   : > { %882 = vsyncadd (%p959_p4), %s152_s7, 4294966272 }
  0x2e   : > { %884 = dma.done.wait (%p40_p1), [#allocation6], 2048  }
  0x2f   : > { %886 = vsyncadd (%p40_p1), [#allocation6], 4294965248  ;;  %v663_v0 = vld [vmem:[#allocation5 + $0x38] sm:$0xff]  ;;  %v662_v2 = vld [vmem:[#allocation5 + $0x30] sm:$0xff]  ;;  %s544_s15 = sshll.u32 %s1024_s5, 5  ;;  %s672_s8 = sshll.u32 %s950_s13, 5 }
  0x30   : > { %v671_v1 = vld [vmem:[#allocation5 + $0x78] sm:$0xff]  ;;  %360 = vmatpush.bf16.msra.mxu0 %v663_v0  ;;  %696 = vmatpush.bf16.msra.mxu2 %v663_v0  ;;  %v670_v3 = vld [vmem:[#allocation5 + $0x70] sm:$0xff]  ;;  %v661_v4 = vld [vmem:[#allocation5 + $0x28] sm:$0xff]  ;;  %s181_s20 = scalar_lea.vmem [#allocation7], %s544_s15  ;;  %s446_s19 = scalar_lea.hbm %s1090_s2, %s672_s8 }
  0x31   : > { %389 = vmatpush.bf16.msra.mxu1 %v671_v1  ;;  %704 = vmatpush.bf16.msra.mxu3 %v671_v1  ;;  %v669_v5 = vld [vmem:[#allocation5 + $0x68] sm:$0xff]  ;;  %v660_v6 = vld [vmem:[#allocation5 + $0x20] sm:$0xff]  ;;  %v659_v8 = vld [vmem:[#allocation5 + $0x18] sm:$0xff]  ;;  %s447_s21 = sshll.u32 %s181_s20, 4  ;;  %s449_s22 = sshll.u32 %s446_s19, 4  ;;  %s448_s21 = int_to_ptr.vmem [resolvable:$true] %s447_s21  ;;  %s450_s22 = int_to_ptr.hbm [resolvable:$true] %s449_s22 }
  0x32   : > { %v668_v7 = vld [vmem:[#allocation5 + $0x60] sm:$0xff]  ;;  %v667_v9 = vld [vmem:[#allocation5 + $0x58] sm:$0xff]  ;;  %v658_v10 = vld [vmem:[#allocation5 + $0x10] sm:$0xff]  ;;  %s435_s13 = scalar_lea.sflag [#allocation4], %s1024_s5  ;;  %s849_s24 = sshra.s32 %s450_s22, 4  ;;  %s850_s24 = int_to_ptr.hbm [resolvable:$true] %s849_s24 }
  0x33   : > { %v666_v11 = vld [vmem:[#allocation5 + $0x50] sm:$0xff]  ;;  %v657_v12 = vld [vmem:[#allocation5 + $0x8] sm:$0xff]  ;;  %v656_v14 = vld [vmem:[#allocation5] sm:$0xff]  ;;  %s851_s25 = scalar_lea.hbm %s850_s24, 32  ;;  %s855_s3 = scalar_lea.hbm %s1090_s2, 64 }
  0x34   : > { %361 = vmatpush.bf16.msra.mxu0 %v662_v2  ;;  %697 = vmatpush.bf16.msra.mxu2 %v662_v2  ;;  %v665_v13 = vld [vmem:[#allocation5 + $0x48] sm:$0xff]  ;;  %v664_v15 = vld [vmem:[#allocation5 + $0x40] sm:$0xff]  ;;  %v555_v28 = vld [vmem:[%s1028_s14 + $0x10] sm:$0xf]  ;;  %p852_p1 = scmp.ne.s32.totalorder %s850_s24, %s851_s25  ;;  %p856_p11 = scmp.lt.s32.totalorder %s850_s24, %s1090_s2 }
  0x35   : > { %390 = vmatpush.bf16.msra.mxu1 %v670_v3  ;;  %705 = vmatpush.bf16.msra.mxu3 %v670_v3  ;;  %v547_v16 = vld [vmem:[%s1028_s14] sm:$0xf]  ;;  %v649_v17 = vld [vmem:[%s1028_s14 + $0x4] sm:$0xf0]  ;;  %v648_v20 = vld [vmem:[%s1028_s14 + $0x4] sm:$0xf]  ;;  %p857_p9 = scmp.lt.s32.totalorder %s855_s3, %s851_s25 }
  0x36   : > { %v563_v18 = vld [vmem:[%s1028_s14 + $0x20] sm:$0xf]  ;;  %v653_v19 = vld [vmem:[%s1028_s14 + $0x24] sm:$0xf0]  ;;  %v549_v21 = vld [vmem:[%s1028_s14 + $0x8] sm:$0xf0]  ;;  %v548_v24 = vor.u32 %v649_v17, %v547_v16  ;;  %p853_p4 = pnand %p852_p1, %p996_p7 }
  0x37   : > { %v652_v22 = vld [vmem:[%s1028_s14 + $0x24] sm:$0xf]  ;;  %v565_v23 = vld [vmem:[%s1028_s14 + $0x28] sm:$0xf0]  ;;  %v564_v25 = vor.u32 %v653_v19, %v563_v18  ;;  %v552_v26 = vor.u32 %v648_v20, %v549_v21  ;;  %v651_v29 = vld [vmem:[%s1028_s14 + $0x14] sm:$0xf0]  ;;  %p858_p2 = por %p857_p9, %p856_p11 }
  0x38   : > { %362 = vmatpush.bf16.msra.mxu0 %v661_v4  ;;  %698 = vmatpush.bf16.msra.mxu2 %v661_v4  ;;  %v568_v27 = vor.u32 %v652_v22, %v565_v23  ;;  %v571_v30 = vld [vmem:[%s1028_s14 + $0x30] sm:$0xf]  ;;  %v655_v31 = vld [vmem:[%s1028_s14 + $0x34] sm:$0xf0]  ;;  %v650_v32 = vld [vmem:[%s1028_s14 + $0x14] sm:$0xf]  ;;  %v556_v36 = vor.u32 %v651_v29, %v555_v28  ;;  %p854_p8 = pneg %p853_p4 }
  0x39   : > { %391 = vmatpush.bf16.msra.mxu1 %v669_v5  ;;  %706 = vmatpush.bf16.msra.mxu3 %v669_v5  ;;  %v557_v33 = vld [vmem:[%s1028_s14 + $0x18] sm:$0xf0]  ;;  %v654_v34 = vld [vmem:[%s1028_s14 + $0x34] sm:$0xf]  ;;  %v572_v37 = vor.u32 %v655_v31, %v571_v30 }
  0x3a   : > { %v573_v35 = vld [vmem:[%s1028_s14 + $0x38] sm:$0xf0]  ;;  %v560_v38 = vor.u32 %v650_v32, %v557_v33  ;;  %p859_p10 = pnand %p858_p2, %p854_p8 }
  0x3b   : > { %v576_v39 = vor.u32 %v654_v34, %v573_v35 }
  0x3c   : > { %363 = vmatpush.bf16.msra.mxu0 %v660_v6  ;;  %699 = vmatpush.bf16.msra.mxu2 %v660_v6 }
  0x3d   : > { %392 = vmatpush.bf16.msra.mxu1 %v668_v7  ;;  %707 = vmatpush.bf16.msra.mxu3 %v668_v7 }
  0x40   : > { %364 = vmatpush.bf16.msra.mxu0 %v659_v8  ;;  %700 = vmatpush.bf16.msra.mxu2 %v659_v8 }
  0x41   : > { %393 = vmatpush.bf16.msra.mxu1 %v667_v9  ;;  %708 = vmatpush.bf16.msra.mxu3 %v667_v9 }
  0x44   : > { %365 = vmatpush.bf16.msra.mxu0 %v658_v10  ;;  %701 = vmatpush.bf16.msra.mxu2 %v658_v10 }
  0x45   : > { %394 = vmatpush.bf16.msra.mxu1 %v666_v11  ;;  %709 = vmatpush.bf16.msra.mxu3 %v666_v11 }
  0x48   : > { %366 = vmatpush.bf16.msra.mxu0 %v657_v12  ;;  %702 = vmatpush.bf16.msra.mxu2 %v657_v12 }
  0x49   : > { %395 = vmatpush.bf16.msra.mxu1 %v665_v13  ;;  %710 = vmatpush.bf16.msra.mxu3 %v665_v13 }
  0x4c   : > { %367 = vmatpush.bf16.msra.mxu0 %v656_v14  ;;  %703 = vmatpush.bf16.msra.mxu2 %v656_v14 }
  0x4d   : > { %396 = vmatpush.bf16.msra.mxu1 %v664_v15  ;;  %711 = vmatpush.bf16.msra.mxu3 %v664_v15 }
  0x4f   : > { %368 = vmatmul.bf16.vlgmr.msra.gmra.mxu0 %v548_v24  ;;  %378 = vmatmul.bf16.vlgmr.msra.gmra.mxu2 %v564_v25 }
  0x50   : > { %397 = vmatmul.bf16.vlgmr.msra.gmra.mxu1 %v552_v26  ;;  %407 = vmatmul.bf16.vlgmr.msra.gmra.mxu3 %v568_v27 }
  0x5f   : > { %373 = vmatmul.bf16.gmra.mxu0 %v556_v36  ;;  %383 = vmatmul.bf16.gmra.mxu2 %v572_v37 }
  0x60   : > { %402 = vmatmul.bf16.gmra.mxu1 %v560_v38  ;;  %412 = vmatmul.bf16.gmra.mxu3 %v576_v39 }
  0xcc   : > { %v369_v40 = vpop.f32.mrf.mxu0 }
  0xcd   : > { %v398_v41 = vpop.f32.mrf.mxu1 }
  0xce   : > { %v399_v46 = vadd.f32 %v398_v41, %v369_v40 }
  0xd2   : > { %v379_v42 = vpop.f32.mrf.mxu2 }
  0xd3   : > { %v408_v43 = vpop.f32.mrf.mxu3 }
  0xd4   : > { %v371_v44 = vpop.f32.mrf.mxu0  ;;  %v409_v51 = vadd.f32 %v408_v43, %v379_v42 }
  0xd5   : > { %v400_v45 = vpop.f32.mrf.mxu1 }
  0xd6   : > { %v401_v47 = vadd.f32 %v400_v45, %v371_v44 }
  0xd8   : > { %v676_v48 = vpack.c.bf16 %v401_v47, %v399_v46 }
  0xda   : > { %677 = vst [vmem:[%s181_s20] sm:$0xff] %v676_v48   ;;  %v381_v49 = vpop.f32.mrf.mxu2 }
  0xdb   : > { %v410_v50 = vpop.f32.mrf.mxu3 }
  0xdc   : > { %v411_v52 = vadd.f32 %v410_v50, %v381_v49  ;;  %v374_v53 = vpop.f32.mrf.mxu0 }
  0xdd   : > { %v403_v54 = vpop.f32.mrf.mxu1 }
  0xde   : > { %v686_v55 = vpack.c.bf16 %v411_v52, %v409_v51  ;;  %v404_v60 = vadd.f32 %v403_v54, %v374_v53 }
  0xe0   : > { %694 = vst [vmem:[%s181_s20 + $0x10] sm:$0xff] %v686_v55  }
  0xe2   : > { %v384_v56 = vpop.f32.mrf.mxu2 }
  0xe3   : > { %v413_v57 = vpop.f32.mrf.mxu3 }
  0xe4   : > { %v376_v58 = vpop.f32.mrf.mxu0  ;;  %v414_v1 = vadd.f32 %v413_v57, %v384_v56 }
  0xe5   : > { %v405_v59 = vpop.f32.mrf.mxu1 }
  0xe6   : > { %v406_v61 = vadd.f32 %v405_v59, %v376_v58 }
  0xe8   : > { %v681_v62 = vpack.c.bf16 %v406_v61, %v404_v60 }
  0xea   : > { %693 = vst [vmem:[%s181_s20 + $0x8] sm:$0xff] %v681_v62   ;;  %v386_v63 = vpop.f32.mrf.mxu2 }
  0xeb   : > { %v415_v0 = vpop.f32.mrf.mxu3 }
  0xec   : > { %v416_v2 = vadd.f32 %v415_v0, %v386_v63 }
  0xee   : > { %v691_v3 = vpack.c.bf16 %v416_v2, %v414_v1 }
  0xf0   : > { %695 = vst [vmem:[%s181_s20 + $0x18] sm:$0xff] %v691_v3  }
  0xf1   : > { %862 = shalt.err (!%p859_p10)
}
  0xf2   : > { %s912_s5 = smov 64   ;;  %s913_s6 = smov 4  }
  0xf3   : > { %718 = dma.vmem_to_hbm [thread:$0]  (%p996_p7), %s448_s21, 512, %s450_s22, %s435_s13, %s912_s5, %s912_s5, %s913_s6  }
  0xf4 PF: > { %s464_s7 = sand.u32 1, %s893_s9   ;;  %p1096_p12 = scmp.ge.s32.totalorder %s905_s12, 2 }
  0xf5   : > { %s465_s14 = scalar_lea.sflag [#allocation4], %s464_s7 }
  0xf6   : > { %p729_p13 = pnand %p1096_p12, %p964_p6 }
  0xf8   : > { %p730_p0 = pneg %p729_p13 }
  0xfa   : > { %888 = dma.done.wait (%p730_p0), %s465_s14, 512  }
  0xfb   : > { %890 = vsyncadd (%p730_p0), %s465_s14, 4294966784  ;;  %p16_p3 = scmp.ge.s32.totalorder %s982_s23, 4   ;;  %s1097_s9 = smov %s897_s10 }
  0xfc   : > { %s1098_s10 = smov %s901_s11  ;;  %s1099_s11 = smov %s992_s28 }
  0xfd   : > { %s1100_s12 = smov %s982_s23  ;;  %18 = sbr.rel (!%p16_p3) target bundleno = 6 (0x6), region = 77 }
 0x102   :  { %471 = vsyncpa [#allocation3], 1 }
 0x103   :  { %473 = vsyncpa [#allocation3 + $0x1], 1 }
 0x104   :  { %474 = vsyncpa [#allocation6], 1 }
 0x105   :  { %475 = vsyncpa [#allocation4], 1 }
 0x106   :  { %477 = vsyncpa [#allocation4 + $0x1], 1 }

</bundles_post_ra>
